<compile_context>
chip_gen: v7x
topology: tpu7x:2x2x1
jax: 0.10.0
libtpu: 0.0.40
codegen_flags: <defaults>
</compile_context>

<pallas_src>
import functools

import jax
import jax.numpy as jnp
from jax import lax
from jax.experimental import pallas as pl
from jax.experimental.pallas import tpu as pltpu

_MiB = 1024 * 1024


def _round_up(x, m):
    return ((x + m - 1) // m) * m


# ---------------------------------------------------------------------------
# Hardware-aware configuration
# ---------------------------------------------------------------------------
@functools.lru_cache(maxsize=1)
def _hw_config():
    """Returns (mxu_align, vmem_tile_budget, vmem_limit_bytes, num_tensorcores)."""
    kind = ""
    try:
        kind = (jax.devices()[0].device_kind or "").lower()
    except Exception:
        pass

    if "v7" in kind:
        # 64 MiB VMEM per TensorCore, 2x256 MXU, 2 TensorCores per chip.
        return 256, 40 * _MiB, 48 * _MiB, 2
    if "v6" in kind:
        # 128 MiB VMEM, 2x256 MXU.
        return 256, 64 * _MiB, 96 * _MiB, 1
    if "v5" in kind:
        # v5e: 128 MiB physical VMEM but 16 MiB scoped default -> explicit limit.
        return 128, 48 * _MiB, 64 * _MiB, 1

    # Unknown chip: stay safely under the smallest scoped-VMEM default.
    budget, limit = 12 * _MiB, None
    try:
        cap = int(pltpu.get_tpu_info().vmem_capacity_bytes)
        budget = min(cap // 3, 40 * _MiB)
        limit = min(cap // 2, 64 * _MiB)
    except Exception:
        pass
    return 128, budget, limit, 1


# ---------------------------------------------------------------------------
# Tile selection
# ---------------------------------------------------------------------------
def _choose_tiles(B, K, N, z_item, w_item, out_item, align, vmem_budget, num_tc,
                  tile_b=None, tile_n=None, tile_k=None):
    user_b, user_n = tile_b is not None, tile_n is not None

    if tile_k is None:
        tile_k = K if K <= 8192 else 2048     # keep the whole K if at all possible
    tile_k = min(tile_k, K)

    if tile_n is None:
        if N <= 128:
            tile_n = N                         # full dim (lane-dim == N is allowed)
        else:
            tile_n = min(_round_up(N, align), 1024)
            if tile_n > N:
                tile_n = N
    if tile_b is None:
        tile_b = min(_round_up(B, 8), 512)
        if tile_b > B:
            tile_b = B

    def fits(tb, tn, tk):
        ksplit = tk < K
        wbuf = 3 if ksplit else 2              # weight triple-buffered when K split
        need = 2 * tb * tk * z_item            # z (double-buffered)
        need += wbuf * tn * tk * w_item        # weight
        need += 2 * tb * tn * out_item         # output
        need += 2 * tn * 4                     # bias (f32)
        if ksplit:
            need += tb * tn * 4                # f32 accumulator scratch
        return need <= vmem_budget

    def shrink_n(tn):
        if tn <= align:
            return tn, False
        new = max(align, _round_up(tn // 2, align))
        return (new, True) if new < tn else (tn, False)

    def shrink_b(tb):
        if tb <= 8:
            return tb, False
        new = max(8, _round_up(tb // 2, 8))
        return (new, True) if new < tb else (tb, False)

    def shrink_k(tk):
        if tk <= align:
            return tk, False
        new = max(align, _round_up(tk // 2, align))
        return (new, True) if new < tk else (tk, False)

    # HBM re-stream traffic ~ N*K*B*(1/tb + 1/tn): keep tb/tn balanced (shrink
    # the larger first) and keep tk = K as long as possible (no accumulator RMW).
    while not fits(tile_b, tile_n, tile_k):
        if tile_n >= tile_b:
            tile_n, ok = shrink_n(tile_n)
            if not ok:
                tile_b, ok = shrink_b(tile_b)
        else:
            tile_b, ok = shrink_b(tile_b)
            if not ok:
                tile_n, ok = shrink_n(tile_n)
        if not ok:
            tile_k, ok = shrink_k(tile_k)
        if not ok:
            break

    # v7x: 2 TensorCores are fed via the "parallel" grid axes -- make sure at
    # least one such axis has >= 2 blocks, otherwise one core idles.
    if num_tc >= 2 and pl.cdiv(B, tile_b) == 1 and pl.cdiv(N, tile_n) == 1:
        if not user_n and N >= 2 * align:
            tile_n = max(align, _round_up(pl.cdiv(N, 2), align))
        elif not user_b and B >= 16:
            tile_b = max(8, _round_up(pl.cdiv(B, 2), 8))

    return tile_b, tile_n, tile_k


# ---------------------------------------------------------------------------
# Kernels
# ---------------------------------------------------------------------------
def _linear_kernel_nosplit(z_ref, w_ref, b_ref, o_ref, *, w_is_kn):
    # z_ref: (TB, K)  w_ref: (K, TN) if w_is_kn else (TN, K)
    # b_ref: (1, TN) f32  o_ref: (TB, TN)
    dn = (((1,), (0,)), ((), ())) if w_is_kn else (((1,), (1,)), ((), ()))
    acc = lax.dot_general(z_ref[...], w_ref[...], dimension_numbers=dn,
                          preferred_element_type=jnp.float32)
    o_ref[...] = (acc + b_ref[...].astype(jnp.float32)).astype(o_ref.dtype)


def _linear_kernel_ksplit(z_ref, w_ref, b_ref, o_ref, acc_ref, *, w_is_kn):
    # z_ref: (TB, TK)  w_ref: (TK, TN)/(TN, TK)  acc_ref: (TB, TN) f32 scratch
    k = pl.program_id(2)

    @pl.when(k == 0)
    def _():
        # Fold the bias into the accumulator init (saves an epilogue add).
        acc_ref[...] = jnp.broadcast_to(b_ref[...].astype(jnp.float32),
                                        acc_ref.shape)

    dn = (((1,), (0,)), ((), ())) if w_is_kn else (((1,), (1,)), ((), ()))
    acc_ref[...] += lax.dot_general(z_ref[...], w_ref[...], dimension_numbers=dn,
                                    preferred_element_type=jnp.float32)

    @pl.when(k == pl.num_programs(2) - 1)
    def _():
        o_ref[...] = acc_ref[...].astype(o_ref.dtype)


# ---------------------------------------------------------------------------
# Wrapper
# ---------------------------------------------------------------------------
def prepare_decoder_weight(weight, compute_dtype=jnp.bfloat16):
    """One-time preprocessing of the (static) decoder weight.

    Casts PyTorch's [output_dim, latent_dim] weight to the compute dtype and
    transposes it to the MXU-friendly [latent_dim, output_dim] layout. Cache
    the result across calls and pass it via
    decoder_forward(z, w_kn, bias, weight_is_kn=True) so no per-call weight
    cast / relayout HBM traffic remains.
    """
    w = jnp.asarray(weight)
    if compute_dtype is not None:
        w = w.astype(compute_dtype)
    return jnp.transpose(w)


@functools.partial(
    jax.jit,
    static_argnames=("compute_dtype", "weight_is_kn", "tile_b", "tile_n",
                     "tile_k", "vmem_limit_bytes", "vmem_budget_bytes"))
def decoder_forward(z, weight, bias, *, compute_dtype=None, weight_is_kn=False,
                    tile_b=None, tile_n=None, tile_k=None,
                    vmem_limit_bytes=None, vmem_budget_bytes=None):
    """y = z @ W^T + b  (nn.Linear / Decoder forward).

    z:      [B, latent_dim]
    weight: [output_dim, latent_dim]  (PyTorch layout), or if weight_is_kn
            [latent_dim, output_dim]  (e.g. from prepare_decoder_weight()).
    bias:   [output_dim]
    Output dtype == z's dtype.  Fast path: bf16 z / weight (or
    compute_dtype=jnp.bfloat16) -> ~3x MXU throughput, half the HBM bytes.
    """
    B, K = z.shape
    if weight_is_kn:
        Kw, N = weight.shape
    else:
        N, Kw = weight.shape
    assert Kw == K, (weight.shape, z.shape)
    assert bias.shape == (N,), bias.shape
    out_dtype = z.dtype

    if compute_dtype is not None:
        cd = jnp.dtype(compute_dtype)
        if z.dtype != cd:
            z = z.astype(cd)
        if weight.dtype != cd:
            # NOTE: avoid this per-call cast by caching prepare_decoder_weight().
            weight = weight.astype(cd)
    elif z.dtype != weight.dtype:
        ct = jnp.result_type(z.dtype, weight.dtype)
        z, weight = z.astype(ct), weight.astype(ct)

    bias2d = bias.astype(jnp.float32).reshape(1, N)

    align, budget_default, limit_default, num_tc = _hw_config()
    budget = vmem_budget_bytes if vmem_budget_bytes is not None else budget_default
    limit = vmem_limit_bytes if vmem_limit_bytes is not None else limit_default

    z_item = jnp.dtype(z.dtype).itemsize
    w_item = jnp.dtype(weight.dtype).itemsize
    out_item = jnp.dtype(out_dtype).itemsize

    tb, tn, tk = _choose_tiles(B, K, N, z_item, w_item, out_item, align, budget,
                               num_tc, tile_b, tile_n, tile_k)

    # Only the reduction (K) axis ever needs zero-padding, and only when it is
    # actually split (tk defaults to K, so this is normally dead code).
    nk = pl.cdiv(K, tk)
    if nk > 1 and K % tk != 0:
        pad = nk * tk - K
        z = jnp.pad(z, ((0, 0), (0, pad)))
        weight = jnp.pad(weight, ((0, pad), (0, 0)) if weight_is_kn
                         else ((0, 0), (0, pad)))

    nb = pl.cdiv(B, tb)
    nn = pl.cdiv(N, tn)

    w_block = (tk, tn) if weight_is_kn else (tn, tk)

    cost = pl.CostEstimate(
        flops=2 * B * K * N,
        transcendentals=0,
        # z is re-streamed once per output-column tile, W once per output-row
        # tile.
        bytes_accessed=(nn * B * K * z_item + nb * N * K * w_item
                        + B * N * out_item + 4 * N),
    )

    if nk == 1:
        kernel = functools.partial(_linear_kernel_nosplit, w_is_kn=weight_is_kn)
        grid = (nb, nn)
        w_idx = (lambda i, j: (0, j)) if weight_is_kn else (lambda i, j: (j, 0))
        in_specs = [
            pl.BlockSpec((tb, tk), lambda i, j: (i, 0)),
            pl.BlockSpec(w_block, w_idx),
            pl.BlockSpec((1, tn), lambda i, j: (0, j)),
        ]
        out_specs = pl.BlockSpec((tb, tn), lambda i, j: (i, j))
        scratch = []
        semantics = ("parallel", "parallel")
    else:
        kernel = functools.partial(_linear_kernel_ksplit, w_is_kn=weight_is_kn)
        grid = (nb, nn, nk)
        w_idx = (lambda i, j, k: (k, j)) if weight_is_kn else (lambda i, j, k: (j, k))
        # Weight tile is the largest per-step DMA: 3-deep buffer when K is split.
        w_spec = pl.BlockSpec(w_block, w_idx)
        if hasattr(pl, "Buffered"):
            try:
                w_spec = pl.BlockSpec(w_block, w_idx, pipeline_mode=pl.Buffered(3))
            except TypeError:
                pass
        in_specs = [
            pl.BlockSpec((tb, tk), lambda i, j, k: (i, k)),
            w_spec,
            pl.BlockSpec((1, tn), lambda i, j, k: (0, j)),
        ]
        out_specs = pl.BlockSpec((tb, tn), lambda i, j, k: (i, j))
        scratch = [pltpu.VMEM((tb, tn), jnp.float32)]
        semantics = ("parallel", "parallel", "arbitrary")

    return pl.pallas_call(
        kernel,
        out_shape=jax.ShapeDtypeStruct((B, N), out_dtype),
        grid_spec=pltpu.PrefetchScalarGridSpec(
            num_scalar_prefetch=0,
            grid=grid,
            in_specs=in_specs,
            out_specs=out_specs,
            scratch_shapes=scratch,
        ),
        compiler_params=pltpu.CompilerParams(
            dimension_semantics=semantics,
            vmem_limit_bytes=limit,
        ),
        cost_estimate=cost,
    )(z, weight, bias2d)


if __name__ == "__main__":
    # Small shapes consistent with Decoder(latent_dim, output_dim).
    batch, latent_dim, output_dim = 8, 32, 64

    key = jax.random.PRNGKey(0)
    kz, kw, kb = jax.random.split(key, 3)

    z = jax.random.normal(kz, (batch, latent_dim), dtype=jnp.float32)
    bound = 1.0 / (latent_dim ** 0.5)
    weight = jax.random.uniform(kw, (output_dim, latent_dim),
                                minval=-bound, maxval=bound, dtype=jnp.float32)
    bias = jax.random.uniform(kb, (output_dim,),
                              minval=-bound, maxval=bound, dtype=jnp.float32)

    y_ref = z @ weight.T + bias

    # 1) Exact f32 path, PyTorch-layout weight, no per-call pads/transposes.
    y = jax.block_until_ready(decoder_forward(z, weight, bias))
    assert y.shape == (batch, output_dim)
    assert jnp.allclose(y, y_ref, atol=1e-5, rtol=1e-5)

    # 2) bf16 compute from f32 inputs (f32 MXU accumulation, f32 output).
    y_bf = jax.block_until_ready(
        decoder_forward(z, weight, bias, compute_dtype=jnp.bfloat16))
    assert y_bf.shape == (batch, output_dim)
    assert jnp.allclose(y_bf, y_ref, atol=2e-2, rtol=2e-2)

    # 3) Fast path: bf16 activations + cached, pre-transposed [K, N] bf16 weight
    #    (no per-call weight cast / relayout HBM traffic at all).
    w_kn = prepare_decoder_weight(weight, jnp.bfloat16)  # cache this across calls
    y_fast = jax.block_until_ready(
        decoder_forward(z.astype(jnp.bfloat16), w_kn, bias, weight_is_kn=True))
    assert y_fast.shape == (batch, output_dim)
    assert jnp.allclose(y_fast.astype(jnp.float32), y_ref, atol=3e-2, rtol=3e-2)

    print("KERNEL_OK")
</pallas_src>

<mosaic_0001>
module attributes {stable_mosaic.version = 11 : i64} {
  func.func @_linear_kernel_nosplit(%arg0: i32, %arg1: i32, %arg2: memref<8x32xf32, #tpu.memory_space<vmem>>, %arg3: memref<64x32xf32, #tpu.memory_space<vmem>>, %arg4: memref<1x64xf32, #tpu.memory_space<vmem>>, %arg5: memref<8x64xf32, #tpu.memory_space<vmem>>) attributes {dimension_semantics = [#tpu.dimension_semantics<parallel>, #tpu.dimension_semantics<parallel>], iteration_bounds = array<i64: 1, 1>, scalar_prefetch = 0 : i64, scratch_operands = 0 : i64, tpu.core_type = #tpu.core_type<tc>, window_params = [{transform_indices = @transform_0, window_bounds = array<i64: 8, 32>}, {transform_indices = @transform_1, window_bounds = array<i64: 64, 32>}, {transform_indices = @transform_2, window_bounds = array<i64: 1, 64>}, {transform_indices = @transform_3, window_bounds = array<i64: 8, 64>}]} {
    %c0 = arith.constant 0 : index
    %c0_0 = arith.constant 0 : index
    %0 = vector.load %arg2[%c0, %c0_0] : memref<8x32xf32, #tpu.memory_space<vmem>>, vector<8x32xf32>
    %c0_1 = arith.constant 0 : index
    %c0_2 = arith.constant 0 : index
    %1 = vector.load %arg3[%c0_1, %c0_2] : memref<64x32xf32, #tpu.memory_space<vmem>>, vector<64x32xf32>
    %cst = arith.constant dense<0.000000e+00> : vector<8x64xf32>
    %2 = tpu.matmul %0, %1, %cst {dimension_numbers = #tpu.dot_dimension_numbers<[1], [1], [0], [0], [0, 0, 1, 0], [], []>} : vector<8x32xf32>, vector<64x32xf32>, vector<8x64xf32> -> vector<8x64xf32>
    %c0_3 = arith.constant 0 : index
    %c0_4 = arith.constant 0 : index
    %3 = vector.load %arg4[%c0_3, %c0_4] : memref<1x64xf32, #tpu.memory_space<vmem>>, vector<1x64xf32>
    %4 = vector.broadcast %3 : vector<1x64xf32> to vector<8x64xf32>
    %5 = arith.addf %2, %4 : vector<8x64xf32>
    %c0_5 = arith.constant 0 : index
    %c0_6 = arith.constant 0 : index
    %6 = vector.load %arg5[%c0_5, %c0_6] : memref<8x64xf32, #tpu.memory_space<vmem>>, vector<8x64xf32>
    tpu.vector_store %arg5[%c0_5, %c0_6], %5 {strides = array<i32>} : memref<8x64xf32, #tpu.memory_space<vmem>>, vector<8x64xf32>,
    return
  }
  func.func @transform_0(%arg0: i32, %arg1: i32) -> (i32, i32) {
    %c0_i32 = arith.constant 0 : i32
    %c0_i32_0 = arith.constant 0 : i32
    return %arg0, %c0_i32 : i32, i32
  }
  func.func @transform_1(%arg0: i32, %arg1: i32) -> (i32, i32) {
    %c0_i32 = arith.constant 0 : i32
    %c0_i32_0 = arith.constant 0 : i32
    return %arg1, %c0_i32 : i32, i32
  }
  func.func @transform_2(%arg0: i32, %arg1: i32) -> (i32, i32) {
    %c0_i32 = arith.constant 0 : i32
    %c0_i32_0 = arith.constant 0 : i32
    return %c0_i32, %arg1 : i32, i32
  }
  func.func @transform_3(%arg0: i32, %arg1: i32) -> (i32, i32) {
    %c0_i32 = arith.constant 0 : i32
    return %arg0, %arg1 : i32, i32
  }
}

</mosaic_0001>

<bundles_post_ra>
// kernel: decoder_forward.1
= control target key start
LH: loop header
LB: loop body
LE: loop exit
PB: predicated region body
PF: predicated region fallthrough
CT: control target
= control target key end

     0   :  { %vm31_vm0 = vcmask 261120   ;;  %v227_v2 = vmov 0.0|0.0   ;;  %vm228_vm2 = vmmov 0   ;;  %v229_v5 = vmov 0.0   ;;  %s308_s0 = inlined_call_operand.vmem [shape: f32[8,32], index: 0, kind: input, shape index: {}]   ;;  %s309_s1 = inlined_call_operand.vmem [shape: f32[64,32], index: 1, kind: input, shape index: {}]   ;;  %s310_s2 = inlined_call_operand.vmem [shape: f32[1,64], index: 2, kind: input, shape index: {}]   ;;  %s311_s3 = inlined_call_operand.hbm [shape: f32[8,64], index: 3, kind: output, shape index: {}]  }
   0x1   :  { %v16_v0 = vld [vmem:[%s309_s1] sm:$0xff]  ;;  %v17_v1 = vld [vmem:[%s309_s1 + $0x8] sm:$0xff]  ;;  %183 = vmatprep.subr.bf16.mxu0 %v227_v2  ;;  %vm259_vm1 = vmpackc.low %vm31_vm0, %vm31_vm0  ;;  %180 = vmatprep.mubr.msk.f32.mxu0 %vm228_vm2, %v229_v5 }
   0x2   :  { %v184_v3 = vpack.c.bf16 %v17_v1, %v16_v0 }
   0x4   :  { %186 = vmatpush3.bf16.xpose.msk.msra.mxu0 %vm259_vm1, %v184_v3 }
   0x5   :  { %8 = vsyncpa [#allocation3], 0  ;;  %187 = vmatprep.subr.bf16.mxu0 %v227_v2  ;;  %v18_v6 = vld [vmem:[%s309_s1 + $0x10] sm:$0xff]  ;;  %v19_v7 = vld [vmem:[%s309_s1 + $0x18] sm:$0xff]  ;;  %s230_s5 = smov [#allocation2]   ;;  %vm129_vm3 = vcmask 523264  }
   0x6   :  { %v188_v8 = vpack.c.bf16 %v19_v7, %v18_v6  ;;  %v20_v9 = vld [vmem:[%s309_s1 + $0x20] sm:$0xff]  ;;  %v21_v10 = vld [vmem:[%s309_s1 + $0x28] sm:$0xff]  ;;  %v22_v12 = vld [vmem:[%s309_s1 + $0x30] sm:$0xff]  ;;  %s137_s6 = sshll.u32 %s230_s5, 4  ;;  %s138_s6 = int_to_ptr.vmem [resolvable:$true] %s137_s6 }
   0x7   :  { %v192_v11 = vpack.c.bf16 %v21_v10, %v20_v9  ;;  %v23_v13 = vld [vmem:[%s309_s1 + $0x38] sm:$0xff]  ;;  %v15_v15 = vld [vmem:[%s308_s0] sm:$0xff]  ;;  %s203_s1 = scalar_lea.vmem %s138_s6, 128  ;;  %p208_p1 = scmp.lt.s32.totalorder %s138_s6, %s138_s6 }
   0x8   :  { %v196_v14 = vpack.c.bf16 %v23_v13, %v22_v12  ;;  %v145_v16 = vld [vmem:[%s310_s2] ss:$0 sm:$0xff]  ;;  %p204_p0 = scmp.ne.s32.totalorder %s138_s6, %s203_s1  ;;  %p209_p2 = scmp.lt.s32.totalorder %s203_s1, %s203_s1 }
   0xa   :  { %p210_p3 = por %p209_p2, %p208_p1 }
   0xc   :  { %190 = vmatpush3.bf16.xpose.msk.msra.mxu0 %vm259_vm1, %v188_v8  ;;  %p211_p4 = pnand %p210_p3, %p204_p0 }
   0xd   :  { %191 = vmatprep.subr.bf16.mxu0 %v227_v2 }
  0x14   :  { %194 = vmatpush3.bf16.xpose.msk.msra.mxu0 %vm259_vm1, %v192_v11 }
  0x15   :  { %195 = vmatprep.subr.bf16.mxu0 %v227_v2 }
  0x1c   :  { %198 = vmatpush3.bf16.xpose.msk.msra.mxu0 %vm259_vm1, %v196_v14 }
  0x23   :  { %181 = vmatmul.mubr.msk.f32.vlgmr.msra.gmra.mrb[0].mxu0 %vm31_vm0, %v15_v15 }
  0xf6   :  { %v125_v17 = vpop.f32.mrb[0].mxu0 }
  0xf7   :  { %v126_v18 = vadd.f32 %v145_v16, %v125_v17  ;;  %v182_v19 = vpop.f32.mrb[1].mxu0 }
  0xf9   :  { %130 = vst.msk [vmem:[#allocation2] sm:$0xff] %vm129_vm3, %v126_v18 }
  0xfa   :  { %214 = shalt.err (!%p211_p4)
}
  0xfb   :  { %s215_s8 = scalar_lea.hbm %s311_s3, 128 }
  0xfc   :  { %p216_p5 = scmp.ne.s32.totalorder %s311_s3, %s215_s8  ;;  %p219_p6 = scmp.lt.u32.totalorder %s215_s8, %s311_s3 }
  0xfe   :  { %p221_p7 = pnand %p219_p6, %p216_p5 }
 0x100   :  { %224 = shalt.err (!%p221_p7)
}
 0x101   :  { %140 = dma.vmem_to_hbm [thread:$0]  %s138_s6, 128, %s311_s3, [#allocation3]  }
 0x102   :  { %225 = dma.done.wait [#allocation3], 128  }
 0x103   :  { %226 = vsyncadd [#allocation3], 4294967168 }
 0x104   :  { %144 = vsyncpa [#allocation3], 1 }

</bundles_post_ra>
